<compile_context>
chip_gen: v7x
topology: tpu7x:2x2x1
jax: 0.10.0
libtpu: 0.0.40
codegen_flags: <defaults>
</compile_context>

<pallas_src>
import jax
import jax.numpy as jnp
from jax.experimental import pallas as pl
from jax.experimental.pallas import tpu as pltpu


# --------------------------------------------------------------------------- #
# Kernel
# --------------------------------------------------------------------------- #
def _loss_partials_kernel(pw_ref, logits_ref, target_ref, out_ref):
    # pw_ref     : (1,) f32 SMEM (scalar prefetch: BCE pos_weight)
    # logits_ref : (TB, C, TS, 128) VMEM tile, native dtype
    # target_ref : (TB, C, TS, 128) VMEM tile, native dtype
    # out_ref    : (1, 1, 32, 128) f32 VMEM: four stacked (8,128) partial slabs
    x = logits_ref[...].astype(jnp.float32)
    y = target_ref[...].astype(jnp.float32)
    pwm1 = pw_ref[0] - 1.0                      # hoisted scalar (pos_weight - 1)

    # Numerically-stable BCE-with-logits (PyTorch formula), all channels.
    e = jnp.exp(-jnp.abs(x))                    # shared with the dice sigmoid
    # TODO(synk): if profiling shows the single EUP port binding (bf16 on
    # v6e/v7x), replace log1p(e) with a short VPU polynomial valid on (0, 1].
    softplus = jnp.log1p(e)
    log_weight = 1.0 + pwm1 * y
    bce = (1.0 - y) * x + log_weight * (softplus + jnp.maximum(-x, 0.0))

    # Dice terms on channel 0 only (tile-aligned slab slice; no masks / iota).
    x0 = x[:, 0, :, :]
    e0 = e[:, 0, :, :]
    y0 = y[:, 0, :, :]
    r0 = pl.reciprocal(1.0 + e0, approx=True)   # EUP approximate reciprocal
    s0 = jnp.where(x0 >= 0.0, r0, e0 * r0)      # sigmoid(x0) from exp(-|x0|)

    # Per-step partials as (8,128) slabs: collapsing the leading dims onto the
    # sublane axis is layout-preserving (TS % 8 == 0), so these sums lower to
    # plain vector adds (VPU), leaving the cross-lane reduce to the wrapper.
    out_ref[0, 0, 0:8, :] = jnp.sum(bce.reshape(-1, 8, 128), axis=0)
    out_ref[0, 0, 8:16, :] = jnp.sum((s0 * y0).reshape(-1, 8, 128), axis=0)
    out_ref[0, 0, 16:24, :] = jnp.sum((y0 * y0).reshape(-1, 8, 128), axis=0)
    out_ref[0, 0, 24:32, :] = jnp.sum((s0 * s0).reshape(-1, 8, 128), axis=0)


# --------------------------------------------------------------------------- #
# Tiling plan
# --------------------------------------------------------------------------- #
def _round_up(n, m):
    return ((n + m - 1) // m) * m


def _largest_divisor_leq(n, k):
    k = max(1, min(n, k))
    while n % k:
        k -= 1
    return k


def _plan_tiles(B, C, HW, itemsize, target_bytes, max_bytes):
    """Pick (TB, TS, R_pad, NS): batch block, spatial-row block, padded rows,
    number of spatial blocks.  TS is a multiple of 8 rows of 128 lanes."""
    lanes = 128
    r0 = -(-HW // lanes)                         # rows of 128 needed per (b, c)
    row_bytes = C * lanes * itemsize             # bytes per spatial row (1 item)
    item_bytes = r0 * row_bytes
    if item_bytes >= target_bytes:
        # Large images: TB = 1, tile spatially at ~target_bytes per input.
        tb = 1
        ts_goal = max(8, (target_bytes // row_bytes) // 8 * 8)
        ns = max(1, -(-r0 // ts_goal))
        ts = _round_up(-(-r0 // ns), 8)
        r_pad = ns * ts
    else:
        # Small images: one spatial block, group batch items per grid step.
        ts = _round_up(r0, 8)
        r_pad = ts
        ns = 1
        tb_goal = max(1, max_bytes // max(1, ts * row_bytes))
        tb = _largest_divisor_leq(B, tb_goal)
    return tb, ts, r_pad, ns


# --------------------------------------------------------------------------- #
# Wrapper
# --------------------------------------------------------------------------- #
def mask_dc_and_bce_loss(low_res_logits, target, pos_weight, dice_weight=0.5,
                         target_tile_bytes=1 << 20, max_tile_bytes=2 << 20):
    """JAX/Pallas equivalent of Mask_DC_and_BCE_loss.forward.

    low_res_logits, target: (B, C, H, W) (or 5-D (B, T, C, H, W), collapsed like
    the PyTorch module).  Inputs keep their native dtype (bf16/f32) in HBM and
    are upcast inside the kernel.  pos_weight: scalar / shape-(1,) BCE
    pos_weight.  Returns a scalar float32 loss.
    """
    if target.ndim == 5:
        target = target.reshape((-1,) + target.shape[2:])
        low_res_logits = low_res_logits.reshape((-1,) + low_res_logits.shape[2:])

    B, C, H, W = low_res_logits.shape
    HW = H * W
    itemsize = jnp.dtype(low_res_logits.dtype).itemsize
    tb, ts, r_pad, ns = _plan_tiles(B, C, HW, itemsize,
                                    target_tile_bytes, max_tile_bytes)
    hw_pad = r_pad * 128

    logits = low_res_logits.reshape(B, C, HW)
    tgt = target.reshape(B, C, HW)
    if hw_pad != HW:
        pad = hw_pad - HW
        # Padding with (logits = -1e4, target = 0) contributes exactly 0 to the
        # BCE sum and to every dice partial (sigmoid(-1e4) == 0 in f32).
        logits = jnp.concatenate(
            [logits, jnp.full((B, C, pad), -1e4, dtype=logits.dtype)], axis=-1)
        tgt = jnp.concatenate(
            [tgt, jnp.zeros((B, C, pad), dtype=tgt.dtype)], axis=-1)

    logits4 = logits.reshape(B, C, r_pad, 128)
    tgt4 = tgt.reshape(B, C, r_pad, 128)
    pw = jnp.asarray(pos_weight, jnp.float32).reshape(-1)[:1]   # shape (1,)

    gb, gs = B // tb, ns
    grid = (gb, gs)

    in_blk = pl.BlockSpec((tb, C, ts, 128), lambda bi, si, pw_ref: (bi, 0, si, 0))
    out_blk = pl.BlockSpec((1, 1, 32, 128), lambda bi, si, pw_ref: (bi, si, 0, 0))

    partials = pl.pallas_call(
        _loss_partials_kernel,
        out_shape=jax.ShapeDtypeStruct((gb, gs, 32, 128), jnp.float32),
        grid_spec=pltpu.PrefetchScalarGridSpec(
            num_scalar_prefetch=1,
            grid=grid,
            in_specs=[in_blk, in_blk],
            out_specs=out_blk,
        ),
        compiler_params=pltpu.CompilerParams(
            # Every grid step owns a distinct output block -> both axes can be
            # 'parallel'; on v7x this shards the grid across the 2 TensorCores.
            dimension_semantics=("parallel", "parallel"),
            vmem_limit_bytes=48 * 1024 * 1024,
        ),
        # NOTE: default double buffering is sufficient at MiB-scale tiles; only
        # bump to pl.Buffered(3) if a profile still shows exposed DMA.
    )(pw, logits4, tgt4)

    # Tiny finalize on host-side XLA: cross-lane reduce of the partial slabs,
    # BCE mean over the TRUE element count, dice ratio, blend.
    slabs = partials.reshape(gb, gs, 4, 8, 128)
    sums = jnp.sum(slabs, axis=(0, 1, 3, 4))            # (4,) f32
    total_elems = jnp.float32(B * C * H * W)
    loss_ce = sums[0] / total_elems
    smooth = 1e-5
    loss_dice = 1.0 - (2.0 * sums[1] + smooth) / (sums[3] + sums[2] + smooth)
    return (1.0 - dice_weight) * loss_ce + dice_weight * loss_dice


# --------------------------------------------------------------------------- #
# Pure-JAX reference mirroring the PyTorch module, for verification.
# --------------------------------------------------------------------------- #
def _reference(low_res_logits, target, pos_weight, dice_weight=0.5):
    x = low_res_logits.astype(jnp.float32)
    y = target.astype(jnp.float32)
    pw = jnp.asarray(pos_weight, jnp.float32)
    log_weight = 1.0 + (pw - 1.0) * y
    bce = (1.0 - y) * x + log_weight * (jnp.log1p(jnp.exp(-jnp.abs(x)))
                                        + jnp.maximum(-x, 0.0))
    loss_ce = jnp.mean(bce)
    s = jax.nn.sigmoid(x)[:, 0]
    t0 = y[:, 0]
    smooth = 1e-5
    intersect = jnp.sum(s * t0)
    y_sum = jnp.sum(t0 * t0)
    z_sum = jnp.sum(s * s)
    loss_dice = 1.0 - (2.0 * intersect + smooth) / (z_sum + y_sum + smooth)
    return (1.0 - dice_weight) * loss_ce + dice_weight * loss_dice


if __name__ == "__main__":
    key = jax.random.PRNGKey(0)
    k1, k2, k3, k4, k5, k6 = jax.random.split(key, 6)
    pos_weight = jnp.array([2.0], dtype=jnp.float32)

    # Case 1: small f32 NCHW; HW=256 padded to one (8,128) slab, batch block=2.
    B, C, H, W = 2, 4, 16, 16
    logits = jax.random.normal(k1, (B, C, H, W), dtype=jnp.float32)
    target = (jax.random.uniform(k2, (B, C, H, W)) > 0.5).astype(jnp.float32)
    loss = jax.block_until_ready(
        mask_dc_and_bce_loss(logits, target, pos_weight, dice_weight=0.5))
    ref = _reference(logits, target, pos_weight, dice_weight=0.5)
    assert jnp.allclose(loss, ref, atol=2e-3, rtol=2e-3), (loss, ref)

    # Case 2: bf16 inputs kept native in HBM; HW=768 padded to 1024 (-1e4 / 0).
    B, C, H, W = 2, 3, 24, 32
    logits = jax.random.normal(k3, (B, C, H, W), dtype=jnp.float32).astype(jnp.bfloat16)
    target = (jax.random.uniform(k4, (B, C, H, W)) > 0.5).astype(jnp.bfloat16)
    loss = jax.block_until_ready(
        mask_dc_and_bce_loss(logits, target, pos_weight, dice_weight=0.5))
    ref = _reference(logits, target, pos_weight, dice_weight=0.5)
    assert jnp.allclose(loss, ref, atol=2e-3, rtol=2e-3), (loss, ref)

    # Case 3: force a multi-step (batch x spatial) grid with tiny tiles to
    # exercise the per-block partial outputs + wrapper reduction (C = 1).
    B, C, H, W = 2, 1, 64, 64
    logits = jax.random.normal(k5, (B, C, H, W), dtype=jnp.float32)
    target = (jax.random.uniform(k6, (B, C, H, W)) > 0.5).astype(jnp.float32)
    loss = jax.block_until_ready(
        mask_dc_and_bce_loss(logits, target, pos_weight, dice_weight=0.5,
                             target_tile_bytes=4096, max_tile_bytes=8192))
    ref = _reference(logits, target, pos_weight, dice_weight=0.5)
    assert jnp.allclose(loss, ref, atol=2e-3, rtol=2e-3), (loss, ref)

    print("KERNEL_OK")
</pallas_src>

<mosaic_0001>
module attributes {stable_mosaic.version = 11 : i64} {
  func.func @_loss_partials_kernel(%arg0: i32, %arg1: i32, %arg2: memref<1xf32, #tpu.memory_space<smem>>, %arg3: memref<2x4x8x128xf32, #tpu.memory_space<vmem>>, %arg4: memref<2x4x8x128xf32, #tpu.memory_space<vmem>>, %arg5: memref<1x1x32x128xf32, #tpu.memory_space<vmem>>) attributes {dimension_semantics = [#tpu.dimension_semantics<parallel>, #tpu.dimension_semantics<parallel>], iteration_bounds = array<i64: 1, 1>, scalar_prefetch = 1 : i64, scratch_operands = 0 : i64, tpu.core_type = #tpu.core_type<tc>, window_params = [{transform_indices = @transform_0, window_bounds = array<i64: 2, 4, 8, 128>}, {transform_indices = @transform_1, window_bounds = array<i64: 2, 4, 8, 128>}, {transform_indices = @transform_2, window_bounds = array<i64: 1, 1, 32, 128>}]} {
    %c0 = arith.constant 0 : index
    %c0_0 = arith.constant 0 : index
    %c0_1 = arith.constant 0 : index
    %c0_2 = arith.constant 0 : index
    %0 = vector.load %arg3[%c0, %c0_0, %c0_1, %c0_2] : memref<2x4x8x128xf32, #tpu.memory_space<vmem>>, vector<2x4x8x128xf32>
    %c0_3 = arith.constant 0 : index
    %c0_4 = arith.constant 0 : index
    %c0_5 = arith.constant 0 : index
    %c0_6 = arith.constant 0 : index
    %1 = vector.load %arg4[%c0_3, %c0_4, %c0_5, %c0_6] : memref<2x4x8x128xf32, #tpu.memory_space<vmem>>, vector<2x4x8x128xf32>
    %c0_7 = arith.constant 0 : index
    %2 = memref.load %arg2[%c0_7] : memref<1xf32, #tpu.memory_space<smem>>
    %cst = arith.constant 1.000000e+00 : f32
    %3 = arith.subf %2, %cst : f32
    %4 = math.absf %0 : vector<2x4x8x128xf32>
    %cst_8 = arith.constant 0.000000e+00 : f32
    %5 = vector.broadcast %cst_8 : f32 to vector<2x4x8x128xf32>
    %6 = arith.subf %5, %4 : vector<2x4x8x128xf32>
    %7 = math.exp %6 : vector<2x4x8x128xf32>
    %8 = math.log1p %7 : vector<2x4x8x128xf32>
    %9 = vector.broadcast %3 : f32 to vector<2x4x8x128xf32>
    %10 = arith.mulf %9, %1 : vector<2x4x8x128xf32>
    %cst_9 = arith.constant 1.000000e+00 : f32
    %11 = vector.broadcast %cst_9 : f32 to vector<2x4x8x128xf32>
    %12 = arith.addf %11, %10 : vector<2x4x8x128xf32>
    %cst_10 = arith.constant 1.000000e+00 : f32
    %13 = vector.broadcast %cst_10 : f32 to vector<2x4x8x128xf32>
    %14 = arith.subf %13, %1 : vector<2x4x8x128xf32>
    %15 = arith.mulf %14, %0 : vector<2x4x8x128xf32>
    %cst_11 = arith.constant 0.000000e+00 : f32
    %16 = vector.broadcast %cst_11 : f32 to vector<2x4x8x128xf32>
    %17 = arith.subf %16, %0 : vector<2x4x8x128xf32>
    %cst_12 = arith.constant 0.000000e+00 : f32
    %18 = vector.broadcast %cst_12 : f32 to vector<2x4x8x128xf32>
    %19 = arith.maximumf %17, %18 : vector<2x4x8x128xf32>
    %20 = arith.addf %8, %19 : vector<2x4x8x128xf32>
    %21 = arith.mulf %12, %20 : vector<2x4x8x128xf32>
    %22 = arith.addf %15, %21 : vector<2x4x8x128xf32>
    %23 = vector.extract_strided_slice %0 {offsets = [0, 0, 0, 0], sizes = [2, 1, 8, 128], strides = [1, 1, 1, 1]} : vector<2x4x8x128xf32> to vector<2x1x8x128xf32>
    %24 = vector.shape_cast %23 : vector<2x1x8x128xf32> to vector<2x8x128xf32>
    %25 = vector.extract_strided_slice %7 {offsets = [0, 0, 0, 0], sizes = [2, 1, 8, 128], strides = [1, 1, 1, 1]} : vector<2x4x8x128xf32> to vector<2x1x8x128xf32>
    %26 = vector.shape_cast %25 : vector<2x1x8x128xf32> to vector<2x8x128xf32>
    %27 = vector.extract_strided_slice %1 {offsets = [0, 0, 0, 0], sizes = [2, 1, 8, 128], strides = [1, 1, 1, 1]} : vector<2x4x8x128xf32> to vector<2x1x8x128xf32>
    %28 = vector.shape_cast %27 : vector<2x1x8x128xf32> to vector<2x8x128xf32>
    %cst_13 = arith.constant 1.000000e+00 : f32
    %29 = vector.broadcast %cst_13 : f32 to vector<2x8x128xf32>
    %30 = arith.addf %29, %26 : vector<2x8x128xf32>
    %31 = tpu.reciprocal %30 {approx = true} : vector<2x8x128xf32> -> vector<2x8x128xf32>
    %cst_14 = arith.constant 0.000000e+00 : f32
    %32 = vector.broadcast %cst_14 : f32 to vector<2x8x128xf32>
    %33 = arith.cmpf oge, %24, %32 : vector<2x8x128xf32>
    %34 = arith.mulf %26, %31 : vector<2x8x128xf32>
    %35 = arith.select %33, %31, %34 : vector<2x8x128xi1>, vector<2x8x128xf32>
    %36 = vector.shape_cast %22 : vector<2x4x8x128xf32> to vector<8x8x128xf32>
    %cst_15 = arith.constant dense<0.000000e+00> : vector<8x128xf32>
    %37 = vector.multi_reduction <add>, %36, %cst_15 [0] : vector<8x8x128xf32> to vector<8x128xf32>
    %c0_16 = arith.constant 0 : index
    %c0_17 = arith.constant 0 : index
    %c0_18 = arith.constant 0 : index
    %c0_19 = arith.constant 0 : index
    %38 = vector.load %arg5[%c0_16, %c0_17, %c0_18, %c0_19] : memref<1x1x32x128xf32, #tpu.memory_space<vmem>>, vector<1x1x8x128xf32>
    %39 = vector.shape_cast %38 : vector<1x1x8x128xf32> to vector<8x128xf32>
    %40 = vector.shape_cast %37 : vector<8x128xf32> to vector<1x1x8x128xf32>
    tpu.vector_store %arg5[%c0_16, %c0_17, %c0_18, %c0_19], %40 {strides = array<i32>} : memref<1x1x32x128xf32, #tpu.memory_space<vmem>>, vector<1x1x8x128xf32>,
    %41 = arith.mulf %35, %28 : vector<2x8x128xf32>
    %cst_20 = arith.constant dense<0.000000e+00> : vector<8x128xf32>
    %42 = vector.multi_reduction <add>, %41, %cst_20 [0] : vector<2x8x128xf32> to vector<8x128xf32>
    %c0_21 = arith.constant 0 : index
    %c0_22 = arith.constant 0 : index
    %c8 = arith.constant 8 : index
    %c0_23 = arith.constant 0 : index
    %43 = vector.load %arg5[%c0_21, %c0_22, %c8, %c0_23] : memref<1x1x32x128xf32, #tpu.memory_space<vmem>>, vector<1x1x8x128xf32>
    %44 = vector.shape_cast %43 : vector<1x1x8x128xf32> to vector<8x128xf32>
    %45 = vector.shape_cast %42 : vector<8x128xf32> to vector<1x1x8x128xf32>
    tpu.vector_store %arg5[%c0_21, %c0_22, %c8, %c0_23], %45 {strides = array<i32>} : memref<1x1x32x128xf32, #tpu.memory_space<vmem>>, vector<1x1x8x128xf32>,
    %46 = arith.mulf %28, %28 : vector<2x8x128xf32>
    %cst_24 = arith.constant dense<0.000000e+00> : vector<8x128xf32>
    %47 = vector.multi_reduction <add>, %46, %cst_24 [0] : vector<2x8x128xf32> to vector<8x128xf32>
    %c0_25 = arith.constant 0 : index
    %c0_26 = arith.constant 0 : index
    %c16 = arith.constant 16 : index
    %c0_27 = arith.constant 0 : index
    %48 = vector.load %arg5[%c0_25, %c0_26, %c16, %c0_27] : memref<1x1x32x128xf32, #tpu.memory_space<vmem>>, vector<1x1x8x128xf32>
    %49 = vector.shape_cast %48 : vector<1x1x8x128xf32> to vector<8x128xf32>
    %50 = vector.shape_cast %47 : vector<8x128xf32> to vector<1x1x8x128xf32>
    tpu.vector_store %arg5[%c0_25, %c0_26, %c16, %c0_27], %50 {strides = array<i32>} : memref<1x1x32x128xf32, #tpu.memory_space<vmem>>, vector<1x1x8x128xf32>,
    %51 = arith.mulf %35, %35 : vector<2x8x128xf32>
    %cst_28 = arith.constant dense<0.000000e+00> : vector<8x128xf32>
    %52 = vector.multi_reduction <add>, %51, %cst_28 [0] : vector<2x8x128xf32> to vector<8x128xf32>
    %c0_29 = arith.constant 0 : index
    %c0_30 = arith.constant 0 : index
    %c24 = arith.constant 24 : index
    %c0_31 = arith.constant 0 : index
    %53 = vector.load %arg5[%c0_29, %c0_30, %c24, %c0_31] : memref<1x1x32x128xf32, #tpu.memory_space<vmem>>, vector<1x1x8x128xf32>
    %54 = vector.shape_cast %53 : vector<1x1x8x128xf32> to vector<8x128xf32>
    %55 = vector.shape_cast %52 : vector<8x128xf32> to vector<1x1x8x128xf32>
    tpu.vector_store %arg5[%c0_29, %c0_30, %c24, %c0_31], %55 {strides = array<i32>} : memref<1x1x32x128xf32, #tpu.memory_space<vmem>>, vector<1x1x8x128xf32>,
    return
  }
  func.func @transform_0(%arg0: i32, %arg1: i32, %arg2: memref<1xf32, #tpu.memory_space<smem>>) -> (i32, i32, i32, i32) {
    %c0_i32 = arith.constant 0 : i32
    %c0_i32_0 = arith.constant 0 : i32
    %c0_i32_1 = arith.constant 0 : i32
    return %arg0, %c0_i32, %arg1, %c0_i32_0 : i32, i32, i32, i32
  }
  func.func @transform_1(%arg0: i32, %arg1: i32, %arg2: memref<1xf32, #tpu.memory_space<smem>>) -> (i32, i32, i32, i32) {
    %c0_i32 = arith.constant 0 : i32
    %c0_i32_0 = arith.constant 0 : i32
    %c0_i32_1 = arith.constant 0 : i32
    return %arg0, %c0_i32, %arg1, %c0_i32_0 : i32, i32, i32, i32
  }
  func.func @transform_2(%arg0: i32, %arg1: i32, %arg2: memref<1xf32, #tpu.memory_space<smem>>) -> (i32, i32, i32, i32) {
    %c0_i32 = arith.constant 0 : i32
    %c0_i32_0 = arith.constant 0 : i32
    %c0_i32_1 = arith.constant 0 : i32
    return %arg0, %arg1, %c0_i32, %c0_i32_0 : i32, i32, i32, i32
  }
}

</mosaic_0001>

<bundles_post_ra>
// kernel: tpu_custom_call.1
= control target key start
LH: loop header
LB: loop body
LE: loop exit
PB: predicated region body
PF: predicated region fallthrough
CT: control target
= control target key end

     0   :  { %9 = vsyncpa [#allocation5], 0  ;;  %s681_s0 = inlined_call_operand.<no memory space> [shape: f32[1], index: 0, kind: input, shape index: {}]   ;;  %s682_s1 = inlined_call_operand.hbm [shape: f32[2,4,8,128], index: 1, kind: input, shape index: {}]   ;;  %s683_s2 = inlined_call_operand.hbm [shape: f32[2,4,8,128], index: 2, kind: input, shape index: {}]   ;;  %s684_s3 = inlined_call_operand.hbm [shape: f32[1,1,32,128], index: 3, kind: output, shape index: {}]  }
   0x1   :  { %10 = vsyncpa [#allocation8], 0 }
   0x2   :  { %11 = vsyncpa [#allocation6], 0  ;;  %s399_s12 = smov [#allocation4]   ;;  %s327_s16 = scalar_lea.hbm %s682_s1, 1024 }
   0x3   :  { %s17_s13 = sshll.u32 %s399_s12, 4  ;;  %p328_p0 = scmp.ne.s32.totalorder %s682_s1, %s327_s16  ;;  %s18_s13 = int_to_ptr.vmem [resolvable:$true] %s17_s13 }
   0x4   :  { %p331_p1 = scmp.lt.u32.totalorder %s327_s16, %s682_s1 }
   0x6   :  { %p333_p2 = pnand %p331_p1, %p328_p0 }
   0x8   :  { %336 = shalt.err (!%p333_p2)
}
   0x9   :  { %s337_s21 = scalar_lea.vmem %s18_s13, 1024  ;;  %p342_p4 = scmp.lt.s32.totalorder %s18_s13, %s18_s13 }
   0xa   :  { %p338_p3 = scmp.ne.s32.totalorder %s18_s13, %s337_s21  ;;  %p343_p5 = scmp.lt.s32.totalorder %s337_s21, %s337_s21 }
   0xc   :  { %p344_p6 = por %p343_p5, %p342_p4 }
   0xe   :  { %p345_p7 = pnand %p344_p6, %p338_p3 }
  0x10   :  { %348 = shalt.err (!%p345_p7)
}
  0x11   :  { %s400_s22 = smov 128   ;;  %s401_s23 = smov 8  }
  0x12   :  { %23 = dma.hbm_to_vmem [thread:$0]  %s682_s1, 1024, %s18_s13, [#allocation5], %s400_s22, %s400_s22, %s401_s23  }
  0x13   :  { %s402_s26 = smov [#allocation7]   ;;  %s349_s30 = scalar_lea.hbm %s683_s2, 1024 }
  0x14   :  { %s29_s27 = sshll.u32 %s402_s26, 4  ;;  %p350_p8 = scmp.ne.s32.totalorder %s683_s2, %s349_s30  ;;  %s30_s27 = int_to_ptr.vmem [resolvable:$true] %s29_s27 }
  0x15   :  { %p353_p9 = scmp.lt.u32.totalorder %s349_s30, %s683_s2 }
  0x17   :  { %p355_p10 = pnand %p353_p9, %p350_p8 }
  0x19   :  { %358 = shalt.err (!%p355_p10)
}
  0x1a   :  { %s359_s8 = scalar_lea.vmem %s30_s27, 1024  ;;  %p364_p12 = scmp.lt.s32.totalorder %s30_s27, %s30_s27 }
  0x1b   :  { %p360_p11 = scmp.ne.s32.totalorder %s30_s27, %s359_s8  ;;  %p365_p13 = scmp.lt.s32.totalorder %s359_s8, %s359_s8 }
  0x1d   :  { %p366_p0 = por %p365_p13, %p364_p12 }
  0x1f   :  { %p367_p1 = pnand %p366_p0, %p360_p11 }
  0x21   :  { %370 = shalt.err (!%p367_p1)
}
  0x22   :  { %35 = dma.hbm_to_vmem [thread:$0]  %s683_s2, 1024, %s30_s27, [#allocation8], %s400_s22, %s400_s22, %s401_s23  }
  0x23   :  { %393 = dma.done.wait [#allocation5], 1024  }
  0x24   :  { %394 = vsyncadd [#allocation5], 4294966272 }
  0x25   :  { %395 = dma.done.wait [#allocation8], 1024  }
  0x26   :  { %396 = vsyncadd [#allocation8], 4294966272  ;;  %s285_s12 = sadd.f32 -1.0, %s681_s0  ;;  %v457_v0 = vld [vmem:[#allocation4] sm:$0xff]  ;;  %v459_v1 = vld [vmem:[#allocation4 + $0x8] sm:$0xff]  ;;  %s403_s0 = smov [#allocation9]  }
  0x27   :  { %v461_v2 = vld [vmem:[#allocation4 + $0x10] sm:$0xff]  ;;  %v463_v3 = vld [vmem:[#allocation4 + $0x18] sm:$0xff]  ;;  %v60_v4 = vand.u32 2147483647, %v457_v0  ;;  %v466_v5 = vld [vmem:[#allocation4 + $0x20] sm:$0xff]  ;;  %v197_v8 = vsub.f32 0.0, %v457_v0 }
  0x28   :  { %v468_v6 = vld [vmem:[#allocation4 + $0x28] sm:$0xff]  ;;  %v61_v7 = vand.u32 2147483647, %v459_v1  ;;  %v472_v9 = vld [vmem:[#allocation4 + $0x30] sm:$0xff]  ;;  %v474_v10 = vld [vmem:[#allocation4 + $0x38] sm:$0xff]  ;;  %v164_v14 = vstv %s285_s12  ;;  %vm241_vm8 = vcmp.ge.f32.partialorder %v457_v0, 0.0 }
  0x29   :  { %v476_v11 = vld [vmem:[#allocation7] sm:$0xff]  ;;  %v62_v12 = vand.u32 2147483647, %v461_v2  ;;  %v68_v13 = vsub.f32 0.0, %v60_v4  ;;  %v479_v15 = vld [vmem:[#allocation7 + $0x8] sm:$0xff]  ;;  %v481_v16 = vld [vmem:[#allocation7 + $0x10] sm:$0xff] }
  0x2a   :  { %686 = vst [vmem:[#allocation13_spill] sm:$0xff] %v476_v11  ;;  %v63_v17 = vand.u32 2147483647, %v463_v3  ;;  %v69_v18 = vsub.f32 0.0, %v61_v7  ;;  %v53_v20 = vld [vmem:[#allocation7 + $0x18] sm:$0xff]  ;;  %v485_v21 = vld [vmem:[#allocation7 + $0x20] sm:$0xff]  ;;  %v165_v29 = vmul.f32 %v164_v14, %v476_v11  ;;  %v166_v41 = vmul.f32 %v164_v14, %v479_v15 }
  0x2b   :  { %v64_v22 = vand.u32 2147483647, %v466_v5  ;;  %v65_v23 = vand.u32 2147483647, %v468_v6  ;;  %v70_v24 = vsub.f32 0.0, %v62_v12  ;;  %v489_v25 = vld [vmem:[#allocation7 + $0x28] sm:$0xff]  ;;  %v167_v42 = vmul.f32 %v164_v14, %v481_v16 }
  0x2c   :  { %v66_v26 = vand.u32 2147483647, %v472_v9  ;;  %v67_v27 = vand.u32 2147483647, %v474_v10  ;;  %v71_v28 = vsub.f32 0.0, %v63_v17  ;;  %v494_v38 = vld [vmem:[#allocation7 + $0x30] sm:$0xff]  ;;  %v168_v43 = vmul.f32 %v164_v14, %v53_v20 }
  0x2d   :  { %v72_v30 = vsub.f32 0.0, %v64_v22  ;;  %v73_v31 = vsub.f32 0.0, %v65_v23  ;;  %v76_v32 = vmul.f32 1.442695, %v68_v13  ;;  %v78_v33 = vmul.f32 1.442695, %v69_v18 }
  0x2e   :  { %v74_v34 = vsub.f32 0.0, %v66_v26  ;;  %v75_v35 = vsub.f32 0.0, %v67_v27  ;;  %v80_v36 = vmul.f32 1.442695, %v70_v24  ;;  %v82_v37 = vmul.f32 1.442695, %v71_v28 }
  0x2f   :  { %v496_v39 = vld [vmem:[#allocation7 + $0x38] sm:$0xff]  ;;  %291 = vpow2.f32 %v76_v32  ;;  %v84_v40 = vmul.f32 1.442695, %v72_v30  ;;  %v169_v44 = vmul.f32 %v164_v14, %v485_v21  ;;  %v503_v45 = vmul.f32 %v476_v11, %v476_v11  ;;  %s272_s2 = sshll.u32 %s403_s0, 4  ;;  %s273_s2 = int_to_ptr.vmem [resolvable:$true] %s272_s2 }
  0x30   :  { %293 = vpow2.f32 %v78_v33  ;;  %v86_v46 = vmul.f32 1.442695, %v73_v31  ;;  %v88_v47 = vmul.f32 1.442695, %v74_v34  ;;  %v170_v48 = vmul.f32 %v164_v14, %v489_v25  ;;  %s371_s13 = scalar_lea.vmem %s273_s2, 512  ;;  %p376_p3 = scmp.lt.s32.totalorder %s273_s2, %s273_s2 }
  0x31   :  { %295 = vpow2.f32 %v80_v36  ;;  %v90_v49 = vmul.f32 1.442695, %v75_v35  ;;  %v171_v50 = vmul.f32 %v164_v14, %v494_v38  ;;  %v172_v51 = vmul.f32 %v164_v14, %v496_v39  ;;  %p372_p2 = scmp.ne.s32.totalorder %s273_s2, %s371_s13  ;;  %p377_p4 = scmp.lt.s32.totalorder %s371_s13, %s371_s13 }
  0x32   :  { %297 = vpow2.f32 %v82_v37  ;;  %v508_v52 = vadd.f32 1.0, %v165_v29  ;;  %v510_v53 = vadd.f32 1.0, %v166_v41  ;;  %v512_v54 = vadd.f32 1.0, %v167_v42 }
  0x33   :  { %299 = vpow2.f32 %v84_v40  ;;  %v514_v55 = vadd.f32 1.0, %v168_v43  ;;  %v181_v56 = vsub.f32 1.0, %v476_v11  ;;  %v182_v57 = vsub.f32 1.0, %v479_v15  ;;  %p378_p5 = por %p377_p4, %p376_p3 }
  0x34   :  { %v183_v58 = vsub.f32 1.0, %v481_v16  ;;  %301 = vpow2.f32 %v86_v46  ;;  %v519_v59 = vadd.f32 1.0, %v169_v44  ;;  %v184_v60 = vsub.f32 1.0, %v53_v20 }
  0x35   :  { %v185_v61 = vsub.f32 1.0, %v485_v21  ;;  %303 = vpow2.f32 %v88_v47  ;;  %v522_v62 = vadd.f32 1.0, %v170_v48  ;;  %v524_v63 = vadd.f32 1.0, %v171_v50  ;;  %p379_p6 = pnand %p378_p5, %p372_p2 }
  0x36   :  { %v526_v4 = vadd.f32 1.0, %v172_v51  ;;  %305 = vpow2.f32 %v90_v49  ;;  %v532_v14 = vmul.f32 %v181_v56, %v457_v0  ;;  %v535_v15 = vmul.f32 %v182_v57, %v459_v1 }
  0x37   :  { %v538_v16 = vmul.f32 %v183_v58, %v461_v2  ;;  %v541_v17 = vmul.f32 %v184_v60, %v463_v3  ;;  %v546_v20 = vmul.f32 %v185_v61, %v466_v5  ;;  %v564_v46 = vmax.f32 %v197_v8, 0.0 }
  0x38   :  { %vm242_vm9 = vcmp.ge.f32.partialorder %v466_v5, 0.0 }
  0x39   :  { %v543_v18 = vpop.eup %291 }
  0x3a   :  { %v294_v26 = vpop.eup %293  ;;  %v552_v27 = vadd.f32 1.0, %v543_v18  ;;  %v95_v28 = vmul.f32 -0.5, %v543_v18  ;;  %v98_v29 = vand.u32 2147483647, %v543_v18 }
  0x3b   :  { %v296_v31 = vpop.eup %295  ;;  %v101_v32 = vadd.f32 1.0, %v294_v26  ;;  %v104_v33 = vmul.f32 -0.5, %v294_v26  ;;  %v107_v34 = vand.u32 2147483647, %v294_v26 }
  0x3c   :  { %v298_v36 = vpop.eup %297  ;;  %307 = vlog2.f32 %v552_v27  ;;  %v96_v37 = vadd.f32 1.0, %v95_v28  ;;  %v110_v40 = vadd.f32 1.0, %v296_v31  ;;  %v113_v44 = vmul.f32 -0.5, %v296_v31 }
  0x3d   :  { %v560_v42 = vpop.eup %299  ;;  %309 = vlog2.f32 %v101_v32  ;;  %v105_v43 = vadd.f32 1.0, %v104_v33  ;;  %vm566_vm0 = vcmp.lt.f32.partialorder %v98_v29, 0.0004427343  ;;  %v116_v48 = vand.u32 2147483647, %v296_v31 }
  0x3e   :  { %311 = vlog2.f32 %v110_v40  ;;  %v119_v49 = vadd.f32 1.0, %v298_v36  ;;  %v302_v50 = vpop.eup %301  ;;  %vm570_vm1 = vcmp.lt.f32.partialorder %v107_v34, 0.0004427343  ;;  %v114_v56 = vadd.f32 1.0, %v113_v44 }
  0x3f   :  { %v122_v57 = vmul.f32 -0.5, %v298_v36  ;;  %v125_v58 = vand.u32 2147483647, %v298_v36  ;;  %v304_v60 = vpop.eup %303  ;;  %v97_v61 = vmul.f32 %v543_v18, %v96_v37  ;;  %v128_v8 = vadd.f32 1.0, %v560_v42 }
  0x40   :  { %313 = vlog2.f32 %v119_v49  ;;  %v131_v28 = vmul.f32 -0.5, %v560_v42  ;;  %v306_v29 = vpop.eup %305  ;;  %v106_v32 = vmul.f32 %v294_v26, %v105_v43  ;;  %vm577_vm2 = vcmp.lt.f32.partialorder %v116_v48, 0.0004427343 }
  0x41   :  { %v123_v34 = vadd.f32 1.0, %v122_v57  ;;  %v134_v40 = vand.u32 2147483647, %v560_v42  ;;  %315 = vlog2.f32 %v128_v8  ;;  %v137_v13 = vadd.f32 1.0, %v302_v50 }
  0x42   :  { %v132_v44 = vadd.f32 1.0, %v131_v28  ;;  %v140_v12 = vmul.f32 -0.5, %v302_v50  ;;  %v115_v7 = vmul.f32 %v296_v31, %v114_v56  ;;  %vm582_vm3 = vcmp.lt.f32.partialorder %v125_v58, 0.0004427343 }
  0x43   :  { %v143_v49 = vand.u32 2147483647, %v302_v50  ;;  %v146_v41 = vadd.f32 1.0, %v304_v60  ;;  %v124_v35 = vmul.f32 %v298_v36, %v123_v34  ;;  %317 = vlog2.f32 %v137_v13 }
  0x44   :  { %v141_v26 = vadd.f32 1.0, %v140_v12  ;;  %v149_v43 = vmul.f32 -0.5, %v304_v60  ;;  %vm586_vm4 = vcmp.lt.f32.partialorder %v134_v40, 0.0004427343  ;;  %v152_v57 = vand.u32 2147483647, %v304_v60 }
  0x45   :  { %319 = vlog2.f32 %v146_v41  ;;  %v155_v28 = vadd.f32 1.0, %v306_v29  ;;  %v133_v31 = vmul.f32 %v560_v42, %v132_v44  ;;  %v158_v58 = vmul.f32 -0.5, %v306_v29 }
  0x46   :  { %v308_v30 = vpop.eup %307  ;;  %v150_v56 = vadd.f32 1.0, %v149_v43  ;;  %v161_v24 = vand.u32 2147483647, %v306_v29  ;;  %v142_v19 = vmul.f32 %v302_v50, %v141_v26  ;;  %vm591_vm5 = vcmp.lt.f32.partialorder %v143_v49, 0.0004427343 }
  0x47   :  { %v310_v23 = vpop.eup %309  ;;  %v94_v22 = vmul.f32 0.6931472, %v308_v30  ;;  %321 = vlog2.f32 %v155_v28  ;;  %vm595_vm6 = vcmp.lt.f32.partialorder %v152_v57, 0.0004427343  ;;  %v159_v34 = vadd.f32 1.0, %v158_v58 }
  0x48   :  { %v312_v12 = vpop.eup %311  ;;  %v103_v36 = vmul.f32 0.6931472, %v310_v23  ;;  %v701_v40 = vsub.f32 0.0, %v459_v1  ;;  %v151_v50 = vmul.f32 %v304_v60, %v150_v56  ;;  %v702_v49 = vsub.f32 0.0, %v461_v2 }
  0x49   :  { %v100_v43 = vsel %vm566_vm0, %v97_v61, %v94_v22  ;;  %v112_v30 = vmul.f32 0.6931472, %v312_v12  ;;  %v160_v57 = vmul.f32 %v306_v29, %v159_v34  ;;  %vm607_vm7 = vcmp.lt.f32.partialorder %v161_v24, 0.0004427343 }
  0x4a   :  { %v206_v44 = vmax.f32 %v701_v40, 0.0  ;;  %v207_v26 = vmax.f32 %v702_v49, 0.0  ;;  %v314_v11 = vpop.eup %313  ;;  %v109_v23 = vsel %vm570_vm1, %v106_v32, %v103_v36  ;;  %v705_v1 = vsub.f32 0.0, %v463_v3 }
  0x4b   :  { %v118_v22 = vsel %vm577_vm2, %v115_v7, %v112_v30  ;;  %v121_v47 = vmul.f32 0.6931472, %v314_v11  ;;  %v706_v60 = vsub.f32 0.0, %v466_v5  ;;  %v707_v61 = vsub.f32 0.0, %v468_v6  ;;  %v316_v51 = vpop.eup %315 }
  0x4c   :  { %v208_v58 = vmax.f32 %v705_v1, 0.0  ;;  %v213_v29 = vadd.f32 %v564_v46, %v100_v43  ;;  %v214_v24 = vadd.f32 %v206_v44, %v109_v23  ;;  %v215_v32 = vadd.f32 %v207_v26, %v118_v22 }
  0x4d   :  { %v209_v2 = vmax.f32 %v706_v60, 0.0  ;;  %v210_v56 = vmax.f32 %v707_v61, 0.0  ;;  %323 = vrcp.f32 %v552_v27  ;;  %v127_v3 = vsel %vm582_vm3, %v124_v35, %v121_v47  ;;  %v318_v33 = vpop.eup %317 }
  0x4e   :  { %v130_v12 = vmul.f32 0.6931472, %v316_v51  ;;  %v708_v7 = vsub.f32 0.0, %v472_v9  ;;  %325 = vrcp.f32 %v128_v8  ;;  %v216_v36 = vadd.f32 %v208_v58, %v127_v3 }
  0x4f   :  { %v221_v34 = vmul.f32 %v213_v29, %v508_v52  ;;  %v222_v40 = vmul.f32 %v214_v24, %v510_v53  ;;  %v223_v46 = vmul.f32 %v215_v32, %v512_v54  ;;  %v320_v44 = vpop.eup %319  ;;  %v139_v43 = vmul.f32 0.6931472, %v318_v33  ;;  %v713_v24 = vld [vmem:[#allocation13_spill] sm:$0xff] }
  0x50   :  { %v211_v11 = vmax.f32 %v708_v7, 0.0  ;;  %v136_v27 = vsel %vm586_vm4, %v133_v31, %v130_v12  ;;  %v709_v35 = vsub.f32 0.0, %v474_v10  ;;  %v260_v30 = vmul.f32 %v485_v21, %v485_v21 }
  0x51   :  { %v148_v8 = vmul.f32 0.6931472, %v320_v44  ;;  %v217_v49 = vadd.f32 %v209_v2, %v136_v27  ;;  %v224_v26 = vmul.f32 %v216_v36, %v514_v55  ;;  %v229_v52 = vadd.f32 %v221_v34, %v532_v14  ;;  %v322_v53 = vpop.eup %321 }
  0x52   :  { %v212_v37 = vmax.f32 %v709_v35, 0.0  ;;  %v145_v54 = vsel %vm591_vm5, %v142_v19, %v139_v43  ;;  %v230_v48 = vadd.f32 %v222_v40, %v535_v15  ;;  %v231_v31 = vadd.f32 %v223_v46, %v538_v16 }
  0x53   :  { %v261_v23 = vadd.f32 %v260_v30, %v503_v45  ;;  %v154_v1 = vsel %vm595_vm6, %v151_v50, %v148_v8  ;;  %v157_v58 = vmul.f32 0.6931472, %v322_v53  ;;  %v218_v22 = vadd.f32 %v210_v56, %v145_v54 }
  0x54   :  { %v225_v47 = vmul.f32 %v217_v49, %v519_v59  ;;  %v710_v55 = vsub.f32 1.0, %v489_v25  ;;  %v219_v60 = vadd.f32 %v211_v11, %v154_v1  ;;  %v232_v19 = vadd.f32 %v224_v26, %v541_v17 }
  0x55   :  { %v247_v13 = vadd.f32 %v230_v48, %v229_v52  ;;  %262 = vst [vmem:[#allocation9 + $0x10] sm:$0xff] %v261_v23  ;;  %v163_v15 = vsel %vm607_vm7, %v160_v57, %v157_v58  ;;  %v711_v45 = vsub.f32 1.0, %v494_v38  ;;  %v226_v41 = vmul.f32 %v218_v22, %v522_v62 }
  0x56   :  { %v194_v14 = vmul.f32 %v710_v55, %v468_v6  ;;  %v220_v50 = vadd.f32 %v212_v37, %v163_v15  ;;  %v227_v59 = vmul.f32 %v219_v60, %v524_v63  ;;  %v233_v25 = vadd.f32 %v225_v47, %v546_v20 }
  0x57   :  { %v195_v16 = vmul.f32 %v711_v45, %v472_v9  ;;  %v248_v6 = vadd.f32 %v247_v13, %v231_v31  ;;  %v324_v2 = vpop.eup %323  ;;  %v712_v17 = vsub.f32 1.0, %v496_v39 }
  0x58   :  { %v326_v57 = vpop.eup %325  ;;  %v228_v9 = vmul.f32 %v220_v50, %v526_v4  ;;  %v234_v38 = vadd.f32 %v226_v41, %v194_v14  ;;  %v243_v28 = vmul.f32 %v324_v2, %v543_v18 }
  0x59   :  { %v196_v61 = vmul.f32 %v712_v17, %v474_v10  ;;  %v249_v62 = vadd.f32 %v248_v6, %v232_v19  ;;  %v244_v63 = vmul.f32 %v326_v57, %v560_v42  ;;  %v235_v20 = vadd.f32 %v227_v59, %v195_v16 }
  0x5a   :  { %v245_v51 = vsel %vm241_vm8, %v324_v2, %v243_v28 }
  0x5b   :  { %v250_v56 = vadd.f32 %v249_v62, %v233_v25  ;;  %v246_v29 = vsel %vm242_vm9, %v326_v57, %v244_v63  ;;  %v255_v39 = vmul.f32 %v245_v51, %v713_v24  ;;  %v263_v10 = vmul.f32 %v245_v51, %v245_v51 }
  0x5c   :  { %v236_v32 = vadd.f32 %v228_v9, %v196_v61  ;;  %v256_v5 = vmul.f32 %v246_v29, %v485_v21  ;;  %v264_v3 = vmul.f32 %v246_v29, %v246_v29 }
  0x5d   :  { %v251_v0 = vadd.f32 %v250_v56, %v234_v38 }
  0x5e   :  { %v257_v12 = vadd.f32 %v256_v5, %v255_v39  ;;  %v265_v7 = vadd.f32 %v264_v3, %v263_v10 }
  0x5f   :  { %v252_v4 = vadd.f32 %v251_v0, %v235_v20 }
  0x60   :  { %258 = vst [vmem:[#allocation9 + $0x8] sm:$0xff] %v257_v12  ;;  %266 = vst [vmem:[#allocation9 + $0x18] sm:$0xff] %v265_v7 }
  0x61   :  { %v253_v18 = vadd.f32 %v252_v4, %v236_v32 }
  0x63   :  { %254 = vst [vmem:[#allocation9] sm:$0xff] %v253_v18 }
  0x64   :  { %382 = shalt.err (!%p379_p6)
}
  0x65   :  { %s383_s16 = scalar_lea.hbm %s684_s3, 512 }
  0x66   :  { %p384_p7 = scmp.ne.s32.totalorder %s684_s3, %s383_s16  ;;  %p387_p8 = scmp.lt.u32.totalorder %s383_s16, %s684_s3 }
  0x68   :  { %p389_p9 = pnand %p387_p8, %p384_p7 }
  0x6a   :  { %392 = shalt.err (!%p389_p9)
}
  0x6b   :  { %278 = dma.vmem_to_hbm [thread:$0]  %s273_s2, 512, %s684_s3, [#allocation6], %s400_s22, %s400_s22, %s401_s23  }
  0x6c   :  { %397 = dma.done.wait [#allocation6], 512  }
  0x6d   :  { %398 = vsyncadd [#allocation6], 4294966784 }
  0x6e   :  { %282 = vsyncpa [#allocation5], 1 }
  0x6f   :  { %283 = vsyncpa [#allocation8], 1 }
  0x70   :  { %284 = vsyncpa [#allocation6], 1 }

</bundles_post_ra>
